<compile_context>
chip_gen: v5e
topology: v5e:2x2
jax: 0.10.0
libtpu: 0.0.40
codegen_flags: <defaults>
</compile_context>

<pallas_src>
import functools

import jax
import jax.numpy as jnp
from jax.experimental import pallas as pl
from jax.experimental.pallas import tpu as pltpu


# --------------------------------------------------------------------------- #
# Kernel
# --------------------------------------------------------------------------- #
def _mlp_kernel(xT_ref, w1_ref, b1_ref, w2_ref, b2_ref, o_ref, *, layer2_on_mxu):
    """One batch tile, batch on the lane (last) axis.

    xT_ref: (2, TB)          input features, transposed (lane-dense batch)
    w1_ref: (H, 2)           hidden.weight  (PyTorch (out, in) layout)
    b1_ref: (H, 1)           hidden.bias as a column
    w2_ref: (H, 1) or (1, H) output.weight (column for VPU path, row for MXU path)
    b2_ref: (1, 1)           output.bias, scalar in SMEM (f32)
    o_ref : (1, TB)          sigmoid output, lane-dense, f32
    """
    xT = xT_ref[...]                                   # (2, TB)  compute dtype
    w1 = w1_ref[...]                                   # (H, 2)

    # ---- Layer 1 on the VPU: K=2 is MXU-hostile, use two broadcast FMAs.
    # h[j, b] = w1[j, 0] * x[b, 0] + w1[j, 1] * x[b, 1] + b1[j]
    h = (w1[:, 0:1] * xT[0:1, :]
         + w1[:, 1:2] * xT[1:2, :]
         + b1_ref[...])                                # (H, TB)
    h = jnp.maximum(h, 0.0)                            # ReLU (stays in compute dtype)

    # ---- Layer 2 (f32 accumulation).
    if layer2_on_mxu:
        # (1,H) x (H,TB) on the otherwise-idle MXU; frees the saturating VALU.
        y = jnp.dot(w2_ref[...], h, preferred_element_type=jnp.float32)   # (1, TB)
    else:
        # Small H: per-lane multiply + sublane reduction.
        y = jnp.sum((h * w2_ref[...]).astype(jnp.float32),
                    axis=0, keepdims=True)                                 # (1, TB)

    y = y + b2_ref[0, 0]                               # SMEM scalar bias (f32)

    # Sigmoid on the EUP: exp + approximate reciprocal (both on free slots).
    y = pl.reciprocal(1.0 + jnp.exp(-y), approx=True)
    o_ref[...] = y.astype(o_ref.dtype)


# --------------------------------------------------------------------------- #
# Host-side helpers
# --------------------------------------------------------------------------- #
def _round_up(x, m):
    return ((x + m - 1) // m) * m


def _default_compute_dtype():
    """bf16 layer-1 math on v6e/v7x (2x VALU rate); f32 elsewhere (v5e has no
    bf16 VPU path).  Falls back to f32 for anything unrecognized."""
    try:
        kind = jax.devices()[0].device_kind.lower()
    except Exception:  # pragma: no cover - defensive
        return jnp.float32
    if ("v6" in kind) or ("v7" in kind) or ("7x" in kind):
        return jnp.bfloat16
    return jnp.float32


def _pick_batch_tile(B, H, itemsize):
    """Largest lane tile (multiple of 1024) whose (H, TB) hidden intermediate
    stays well inside VMEM on every generation (incl. v7x's 64 MiB), while
    keeping >= 2 grid blocks for large batches so both v7x TensorCores work."""
    budget = 12 * 1024 * 1024                      # bytes for the (H, TB) intermediate
    tb = 8192
    while tb > 1024 and H * tb * itemsize > budget:
        tb //= 2
    if B > 2048:                                   # keep the 'parallel' axis >= 2 blocks
        tb = min(tb, _round_up(-(-B // 2), 1024))
    tb = min(tb, max(1024, _round_up(B, 1024)))    # don't vastly overshoot tiny batches
    return tb


def _vmem_limit_bytes(H, tb, itemsize):
    hidden = H * tb * (itemsize + 4)               # (H,TB) activations + f32-ish temps
    io = 2 * (2 * tb * itemsize + tb * 4)          # double-buffered input/output tiles
    weights = 4 * H * itemsize + 16
    need = 2 * (hidden + io + weights)             # generous headroom
    return int(min(60 * 1024 * 1024, max(32 * 1024 * 1024, need)))


# --------------------------------------------------------------------------- #
# Forward pass
# --------------------------------------------------------------------------- #
def mlp_forward(x, w_hidden, b_hidden, w_out, b_out, *,
                batch_tile=None, compute_dtype=None):
    """Forward pass matching the PyTorch MLP module.

    x        : (B, 2)  float32
    w_hidden : (H, 2)  hidden.weight   (PyTorch nn.Linear layout)
    b_hidden : (H,)    hidden.bias
    w_out    : (1, H)  output.weight
    b_out    : (1,)    output.bias
    returns  : (B, 1)  float32
    """
    B = x.shape[0]
    H = w_hidden.shape[0]

    cd = compute_dtype if compute_dtype is not None else _default_compute_dtype()
    itemsize = jnp.dtype(cd).itemsize

    tb = batch_tile if batch_tile is not None else _pick_batch_tile(B, H, itemsize)

    # Lane-dense layout: batch on the last (lane) axis.  No padding — the grid
    # uses cdiv and Pallas masks the ragged last tile on both read and write.
    xT = x.T.astype(cd)                                  # (2, B)
    w1 = w_hidden.astype(cd)                             # (H, 2)
    b1 = b_hidden.reshape(H, 1).astype(cd)               # (H, 1)
    b2 = b_out.reshape(1, 1).astype(jnp.float32)         # (1, 1) SMEM scalar

    layer2_on_mxu = H >= 256
    if layer2_on_mxu:
        w2 = w_out.reshape(1, H).astype(cd)              # (1, H) row for MXU
        w2_spec = pl.BlockSpec((1, H), lambda i: (0, 0))
    else:
        w2 = w_out.reshape(H, 1).astype(cd)              # (H, 1) column for VPU
        w2_spec = pl.BlockSpec((H, 1), lambda i: (0, 0))

    grid = (pl.cdiv(B, tb),)

    out = pl.pallas_call(
        functools.partial(_mlp_kernel, layer2_on_mxu=layer2_on_mxu),
        out_shape=jax.ShapeDtypeStruct((1, B), jnp.float32),
        grid=grid,
        in_specs=[
            pl.BlockSpec((2, tb), lambda i: (0, i)),            # x tile, lane-dense
            pl.BlockSpec((H, 2), lambda i: (0, 0)),             # w1: resident in VMEM
            pl.BlockSpec((H, 1), lambda i: (0, 0)),             # b1: resident in VMEM
            w2_spec,                                            # w2: resident in VMEM
            pl.BlockSpec((1, 1), lambda i: (0, 0),
                         memory_space=pltpu.MemorySpace.SMEM),  # b2: SMEM scalar
        ],
        out_specs=pl.BlockSpec((1, tb), lambda i: (0, i)),      # lane-dense output
        compiler_params=pltpu.CompilerParams(
            dimension_semantics=("parallel",),                  # shard batch tiles across TCs
            vmem_limit_bytes=_vmem_limit_bytes(H, tb, itemsize),
        ),
    )(xT, w1, b1, w2, b2)

    return out.reshape(B, 1)                                    # (B, 1), PyTorch layout


# --------------------------------------------------------------------------- #
# Reference + init (for the self-test)
# --------------------------------------------------------------------------- #
def init_params(key, n_neurons):
    """Deterministic init mimicking PyTorch nn.Linear's U(-1/sqrt(fan_in), +)."""
    k1, k2, k3, k4 = jax.random.split(key, 4)
    bound1 = 1.0 / jnp.sqrt(2.0)
    bound2 = 1.0 / jnp.sqrt(float(n_neurons))
    w_hidden = jax.random.uniform(k1, (n_neurons, 2), jnp.float32, -bound1, bound1)
    b_hidden = jax.random.uniform(k2, (n_neurons,), jnp.float32, -bound1, bound1)
    w_out = jax.random.uniform(k3, (1, n_neurons), jnp.float32, -bound2, bound2)
    b_out = jax.random.uniform(k4, (1,), jnp.float32, -bound2, bound2)
    return w_hidden, b_hidden, w_out, b_out


def mlp_reference(x, w_hidden, b_hidden, w_out, b_out):
    h = jnp.maximum(x @ w_hidden.T + b_hidden, 0.0)
    return jax.nn.sigmoid(h @ w_out.T + b_out)


if __name__ == "__main__":
    key = jax.random.PRNGKey(0)
    kp1, kp2, kp3, kx1, kx2, kx3 = jax.random.split(key, 6)

    cd = _default_compute_dtype()
    tol = 5e-2 if cd == jnp.bfloat16 else 2e-3   # bf16 layer-1 / approx reciprocal

    # 1) Small batch, small H: single lane tile, VPU layer-2 path.
    params = init_params(kp1, 32)
    x_small = jax.random.normal(kx1, (8, 2), jnp.float32)
    out_small = jax.block_until_ready(mlp_forward(x_small, *params))
    ref_small = mlp_reference(x_small, *params)
    assert out_small.shape == (8, 1), out_small.shape
    assert jnp.allclose(out_small, ref_small, atol=tol, rtol=tol), \
        float(jnp.max(jnp.abs(out_small - ref_small)))

    # 2) Larger batch: multiple grid tiles + ragged (masked) last tile.
    params64 = init_params(kp2, 64)
    x_big = jax.random.normal(kx2, (2600, 2), jnp.float32)
    out_big = jax.block_until_ready(mlp_forward(x_big, *params64))
    ref_big = mlp_reference(x_big, *params64)
    assert out_big.shape == (2600, 1), out_big.shape
    assert jnp.allclose(out_big, ref_big, atol=tol, rtol=tol), \
        float(jnp.max(jnp.abs(out_big - ref_big)))

    # 3) Large H: exercises the MXU layer-2 path.
    params512 = init_params(kp3, 512)
    x_mxu = jax.random.normal(kx3, (16, 2), jnp.float32)
    out_mxu = jax.block_until_ready(mlp_forward(x_mxu, *params512))
    ref_mxu = mlp_reference(x_mxu, *params512)
    assert out_mxu.shape == (16, 1), out_mxu.shape
    assert jnp.allclose(out_mxu, ref_mxu, atol=tol, rtol=tol), \
        float(jnp.max(jnp.abs(out_mxu - ref_mxu)))

    print("KERNEL_OK")
</pallas_src>

<mosaic_0001>
module attributes {stable_mosaic.version = 11 : i64} {
  func.func @_mlp_kernel(%arg0: i32, %arg1: memref<2x1024xf32, #tpu.memory_space<vmem>>, %arg2: memref<32x2xf32, #tpu.memory_space<vmem>>, %arg3: memref<32x1xf32, #tpu.memory_space<vmem>>, %arg4: memref<32x1xf32, #tpu.memory_space<vmem>>, %arg5: memref<1x1xf32, #tpu.memory_space<smem>>, %arg6: memref<1x1024xf32, #tpu.memory_space<vmem>>) attributes {dimension_semantics = [#tpu.dimension_semantics<parallel>], iteration_bounds = array<i64: 1>, scalar_prefetch = 0 : i64, scratch_operands = 0 : i64, tpu.core_type = #tpu.core_type<tc>, window_params = [{transform_indices = @transform_0, window_bounds = array<i64: 2, 1024>}, {pipeline_mode = #tpu.pipeline_mode<synchronous>, transform_indices = @transform_1, window_bounds = array<i64: 32, 2>}, {pipeline_mode = #tpu.pipeline_mode<synchronous>, transform_indices = @transform_2, window_bounds = array<i64: 32, 1>}, {pipeline_mode = #tpu.pipeline_mode<synchronous>, transform_indices = @transform_3, window_bounds = array<i64: 32, 1>}, {transform_indices = @transform_4, window_bounds = array<i64: 1, 1>}, {transform_indices = @transform_5, window_bounds = array<i64: 1, 1024>}]} {
    %c0 = arith.constant 0 : index
    %c0_0 = arith.constant 0 : index
    %0 = vector.load %arg1[%c0, %c0_0] : memref<2x1024xf32, #tpu.memory_space<vmem>>, vector<2x1024xf32>
    %c0_1 = arith.constant 0 : index
    %c0_2 = arith.constant 0 : index
    %1 = vector.load %arg2[%c0_1, %c0_2] : memref<32x2xf32, #tpu.memory_space<vmem>>, vector<32x2xf32>
    %2 = vector.extract_strided_slice %1 {offsets = [0, 0], sizes = [32, 1], strides = [1, 1]} : vector<32x2xf32> to vector<32x1xf32>
    %3 = vector.extract_strided_slice %0 {offsets = [0, 0], sizes = [1, 1024], strides = [1, 1]} : vector<2x1024xf32> to vector<1x1024xf32>
    %4 = vector.broadcast %2 : vector<32x1xf32> to vector<32x1024xf32>
    %5 = vector.broadcast %3 : vector<1x1024xf32> to vector<32x1024xf32>
    %6 = arith.mulf %4, %5 : vector<32x1024xf32>
    %7 = vector.extract_strided_slice %1 {offsets = [0, 1], sizes = [32, 1], strides = [1, 1]} : vector<32x2xf32> to vector<32x1xf32>
    %8 = vector.extract_strided_slice %0 {offsets = [1, 0], sizes = [1, 1024], strides = [1, 1]} : vector<2x1024xf32> to vector<1x1024xf32>
    %9 = vector.broadcast %7 : vector<32x1xf32> to vector<32x1024xf32>
    %10 = vector.broadcast %8 : vector<1x1024xf32> to vector<32x1024xf32>
    %11 = arith.mulf %9, %10 : vector<32x1024xf32>
    %12 = arith.addf %6, %11 : vector<32x1024xf32>
    %c0_3 = arith.constant 0 : index
    %c0_4 = arith.constant 0 : index
    %13 = vector.load %arg3[%c0_3, %c0_4] : memref<32x1xf32, #tpu.memory_space<vmem>>, vector<32x1xf32>
    %14 = vector.broadcast %13 : vector<32x1xf32> to vector<32x1024xf32>
    %15 = arith.addf %12, %14 : vector<32x1024xf32>
    %cst = arith.constant 0.000000e+00 : f32
    %16 = vector.broadcast %cst : f32 to vector<32x1024xf32>
    %17 = arith.maximumf %15, %16 : vector<32x1024xf32>
    %c0_5 = arith.constant 0 : index
    %c0_6 = arith.constant 0 : index
    %18 = vector.load %arg4[%c0_5, %c0_6] : memref<32x1xf32, #tpu.memory_space<vmem>>, vector<32x1xf32>
    %19 = vector.broadcast %18 : vector<32x1xf32> to vector<32x1024xf32>
    %20 = arith.mulf %17, %19 : vector<32x1024xf32>
    %cst_7 = arith.constant dense<0.000000e+00> : vector<1024xf32>
    %21 = vector.multi_reduction <add>, %20, %cst_7 [0] : vector<32x1024xf32> to vector<1024xf32>
    %22 = vector.shape_cast %21 : vector<1024xf32> to vector<1x1024xf32>
    %c0_8 = arith.constant 0 : index
    %c0_9 = arith.constant 0 : index
    %23 = memref.load %arg5[%c0_8, %c0_9] : memref<1x1xf32, #tpu.memory_space<smem>>
    %24 = vector.broadcast %23 : f32 to vector<1x1024xf32>
    %25 = arith.addf %22, %24 : vector<1x1024xf32>
    %cst_10 = arith.constant 0.000000e+00 : f32
    %26 = vector.broadcast %cst_10 : f32 to vector<1x1024xf32>
    %27 = arith.subf %26, %25 : vector<1x1024xf32>
    %28 = math.exp %27 : vector<1x1024xf32>
    %cst_11 = arith.constant 1.000000e+00 : f32
    %29 = vector.broadcast %cst_11 : f32 to vector<1x1024xf32>
    %30 = arith.addf %29, %28 : vector<1x1024xf32>
    %31 = tpu.reciprocal %30 {approx = true} : vector<1x1024xf32> -> vector<1x1024xf32>
    %c0_12 = arith.constant 0 : index
    %c0_13 = arith.constant 0 : index
    %32 = vector.load %arg6[%c0_12, %c0_13] : memref<1x1024xf32, #tpu.memory_space<vmem>>, vector<1x1024xf32>
    tpu.vector_store %arg6[%c0_12, %c0_13], %31 {strides = array<i32>} : memref<1x1024xf32, #tpu.memory_space<vmem>>, vector<1x1024xf32>,
    return
  }
  func.func @transform_0(%arg0: i32) -> (i32, i32) {
    %c0_i32 = arith.constant 0 : i32
    %c0_i32_0 = arith.constant 0 : i32
    return %c0_i32, %arg0 : i32, i32
  }
  func.func @transform_1(%arg0: i32) -> (i32, i32) {
    %c0_i32 = arith.constant 0 : i32
    %c0_i32_0 = arith.constant 0 : i32
    %c0_i32_1 = arith.constant 0 : i32
    return %c0_i32, %c0_i32_0 : i32, i32
  }
  func.func @transform_2(%arg0: i32) -> (i32, i32) {
    %c0_i32 = arith.constant 0 : i32
    %c0_i32_0 = arith.constant 0 : i32
    %c0_i32_1 = arith.constant 0 : i32
    return %c0_i32, %c0_i32_0 : i32, i32
  }
  func.func @transform_3(%arg0: i32) -> (i32, i32) {
    %c0_i32 = arith.constant 0 : i32
    %c0_i32_0 = arith.constant 0 : i32
    %c0_i32_1 = arith.constant 0 : i32
    return %c0_i32, %c0_i32_0 : i32, i32
  }
  func.func @transform_4(%arg0: i32) -> (i32, i32) {
    %c0_i32 = arith.constant 0 : i32
    %c0_i32_0 = arith.constant 0 : i32
    %c0_i32_1 = arith.constant 0 : i32
    return %c0_i32, %c0_i32_0 : i32, i32
  }
  func.func @transform_5(%arg0: i32) -> (i32, i32) {
    %c0_i32 = arith.constant 0 : i32
    %c0_i32_0 = arith.constant 0 : i32
    return %c0_i32, %arg0 : i32, i32
  }
}

</mosaic_0001>

<bundles_post_ra>
// kernel: tpu_custom_call.1
= control target key start
LH: loop header
LB: loop body
LE: loop exit
PB: predicated region body
PF: predicated region fallthrough
CT: control target
= control target key end

     0   :  { %v590_v1 = vmov 1   ;;  %v591_v2 = vmov 0   ;;  %s905_s0 = inlined_call_operand.vmem [shape: f32[2,8], index: 0, kind: input, shape index: {}]   ;;  %s906_s1 = inlined_call_operand.vmem [shape: f32[32,2], index: 1, kind: input, shape index: {}]   ;;  %s907_s2 = inlined_call_operand.vmem [shape: f32[32,1], index: 2, kind: input, shape index: {}]   ;;  %s908_s3 = inlined_call_operand.vmem [shape: f32[32,1], index: 3, kind: input, shape index: {}]   ;;  %s909_s4 = inlined_call_operand.<no memory space> [shape: f32[1,1], index: 4, kind: input, shape index: {}]   ;;  %s910_s5 = inlined_call_operand.hbm [shape: f32[1,8], index: 5, kind: output, shape index: {}]  }
   0x1   :  { %v24_v0 = vld [vmem:[%s906_s1] sm:$0xff]  ;;  %527 = vset.pattern.permute.xlu1 %v590_v1  ;;  %526 = vset.pattern.permute.xlu0 %v591_v2  ;;  %v26_v3 = vld [vmem:[%s906_s1 + $0x10] sm:$0xff] }
   0x2   :  { %107 = vperm.xlu1 %527, %v24_v0   ;;  %30 = vperm.xlu0 %526, %v24_v0  }
   0x3   :  { %528 = vset.pattern.permute.xlu2 %v591_v2 }
   0x4   :  { %11 = vsyncpa [#allocation4], 0  ;;  %40 = vperm.xlu2 %528, %v26_v3   ;;  %v25_v4 = vld [vmem:[%s906_s1 + $0x8] sm:$0xff]  ;;  %v27_v5 = vld [vmem:[%s906_s1 + $0x18] sm:$0xff]  ;;  %vm491_vm0 = vcmask 1040384   ;;  %vm493_vm1 = vcmask 1042434  }
   0x5   :  { %v210_v6 = vld [vmem:[%s907_s2] sm:$0xff]  ;;  %v211_v7 = vld [vmem:[%s907_s2 + $0x8] sm:$0xff]  ;;  %v212_v8 = vld [vmem:[%s907_s2 + $0x10] sm:$0xff]  ;;  %vm497_vm2 = vcmask 1044484   ;;  %vm495_vm3 = vcmask 1041408   ;;  %vm499_vm4 = vcmask 1046534  }
   0x6   :  { %v213_v9 = vld [vmem:[%s907_s2 + $0x18] sm:$0xff]  ;;  %v298_v10 = vld [vmem:[%s908_s3] sm:$0xff]  ;;  %v299_v11 = vld [vmem:[%s908_s3 + $0x8] sm:$0xff]  ;;  %vm501_vm5 = vcmask 1045508   ;;  %vm503_vm6 = vcmask 1043456  }
   0x7   :  { %v300_v12 = vld [vmem:[%s908_s3 + $0x10] sm:$0xff]  ;;  %v301_v13 = vld [vmem:[%s908_s3 + $0x18] sm:$0xff]  ;;  %v22_v15 = vld [vmem:[%s905_s0] sm:$0xff] }
   0x8   :  { %v23_v16 = vld [vmem:[%s905_s0 + $0x8] sm:$0xff]  ;;  %v50_v17 = vperm.slane %v22_v15, 0  ;;  %v51_v18 = vperm.slane %v22_v15, 2  ;;  %v52_v19 = vperm.slane %v22_v15, 4  ;;  %v53_v20 = vperm.slane %v22_v15, 6 }
   0x9   :  { %v54_v21 = vperm.slane %v23_v16, 0  ;;  %v55_v22 = vperm.slane %v23_v16, 2  ;;  %v56_v23 = vperm.slane %v23_v16, 4  ;;  %v57_v24 = vperm.slane %v23_v16, 6 }
   0xa   :  { %111 = vperm.xlu1 %527, %v25_v4   ;;  %35 = vperm.xlu0 %526, %v25_v4   ;;  %v122_v25 = vperm.slane %v22_v15, 1  ;;  %v123_v26 = vperm.slane %v22_v15, 3  ;;  %v124_v27 = vperm.slane %v22_v15, 5  ;;  %v125_v28 = vperm.slane %v22_v15, 7 }
   0xb   :  { %v126_v29 = vperm.slane %v23_v16, 1  ;;  %v665_v30 = vperm.slane %v50_v17, 0  ;;  %v667_v31 = vperm.slane %v51_v18, 0  ;;  %v127_v32 = vperm.slane %v23_v16, 3 }
   0xc   :  { %529 = vset.pattern.permute.xlu2 %v590_v1  ;;  %v128_v33 = vperm.slane %v23_v16, 5  ;;  %v669_v34 = vperm.slane %v52_v19, 0  ;;  %v671_v35 = vperm.slane %v53_v20, 0  ;;  %v673_v36 = vperm.slane %v54_v21, 0 }
   0xd   :  { %115 = vperm.xlu2 %529, %v26_v3   ;;  %v129_v37 = vperm.slane %v23_v16, 7  ;;  %v675_v38 = vperm.slane %v55_v22, 0  ;;  %v677_v39 = vperm.slane %v56_v23, 0  ;;  %v679_v40 = vperm.slane %v57_v24, 0 }
   0xe   :  { %v681_v42 = vperm.slane %v122_v25, 1  ;;  %v683_v43 = vperm.slane %v123_v26, 1  ;;  %v685_v44 = vperm.slane %v124_v27, 1  ;;  %v687_v45 = vperm.slane %v125_v28, 1 }
   0xf   :  { %v689_v46 = vperm.slane %v126_v29, 1  ;;  %v692_v48 = vperm.slane %v127_v32, 1  ;;  %v694_v49 = vperm.slane %v128_v33, 1  ;;  %v700_v54 = vperm.slane %v129_v37, 1 }
  0x12   :  { %119 = vperm.xlu1 %527, %v27_v5   ;;  %45 = vperm.xlu0 %526, %v27_v5  }
  0x15   :  { %530 = vset.pattern.permute.xlu2 %v591_v2 }
  0x16   :  { %216 = vperm.xlu2 %530, %v210_v6  }
  0x1a   :  { %531 = vset.pattern.permute.xlu1 %v591_v2  ;;  %221 = vperm.xlu0 %526, %v211_v7  }
  0x1b   :  { %226 = vperm.xlu1 %531, %v212_v8  }
  0x1e   :  { %231 = vperm.xlu2 %530, %v213_v9  }
  0x22   :  { %304 = vperm.xlu0 %526, %v298_v10  }
  0x23   :  { %309 = vperm.xlu1 %531, %v299_v11  }
  0x26   :  { %314 = vperm.xlu2 %530, %v300_v12  }
  0x2a   :  { %319 = vperm.xlu0 %526, %v301_v13  }
  0x5e   :  { %v41_v14 = vpop.permute.xlu2 %40 }
  0x5f   :  { %v90_v47 = vmul.f32 %v665_v30, %v41_v14  ;;  %v91_v51 = vmul.f32 %v667_v31, %v41_v14  ;;  %v92_v52 = vmul.f32 %v669_v34, %v41_v14  ;;  %v93_v53 = vmul.f32 %v671_v35, %v41_v14 }
  0x60   :  { %v94_v55 = vmul.f32 %v673_v36, %v41_v14  ;;  %v95_v56 = vmul.f32 %v675_v38, %v41_v14  ;;  %v96_v57 = vmul.f32 %v677_v39, %v41_v14  ;;  %v97_v58 = vmul.f32 %v679_v40, %v41_v14 }
  0x67   :  { %v116_v41 = vpop.permute.xlu2 %115 }
  0x68   :  { %v162_v50 = vmul.f32 %v681_v42, %v116_v41  ;;  %v163_v59 = vmul.f32 %v683_v43, %v116_v41  ;;  %v164_v60 = vmul.f32 %v685_v44, %v116_v41  ;;  %v165_v61 = vmul.f32 %v687_v45, %v116_v41 }
  0x69   :  { %v166_v62 = vmul.f32 %v689_v46, %v116_v41  ;;  %v167_v63 = vmul.f32 %v692_v48, %v116_v41  ;;  %v168_v0 = vmul.f32 %v694_v49, %v116_v41  ;;  %v169_v1 = vmul.f32 %v700_v54, %v116_v41 }
  0x6a   :  { %v713_v4 = vadd.f32 %v162_v50, %v90_v47 }
  0x70   :  { %v217_v21 = vpop.permute.xlu2 %216 }
  0x74   :  { %v108_v2 = vpop.permute.xlu1 %107  ;;  %v31_v3 = vpop.permute.xlu0 %30 }
  0x75   :  { %v146_v5 = vmul.f32 %v681_v42, %v108_v2  ;;  %v147_v6 = vmul.f32 %v683_v43, %v108_v2  ;;  %v148_v7 = vmul.f32 %v685_v44, %v108_v2  ;;  %v149_v8 = vmul.f32 %v687_v45, %v108_v2 }
  0x76   :  { %v150_v9 = vmul.f32 %v689_v46, %v108_v2  ;;  %v151_v10 = vmul.f32 %v692_v48, %v108_v2  ;;  %v152_v11 = vmul.f32 %v694_v49, %v108_v2  ;;  %v153_v12 = vmul.f32 %v700_v54, %v108_v2 }
  0x77   :  { %v74_v13 = vmul.f32 %v665_v30, %v31_v3  ;;  %v75_v14 = vmul.f32 %v667_v31, %v31_v3  ;;  %v76_v15 = vmul.f32 %v669_v34, %v31_v3  ;;  %v77_v16 = vmul.f32 %v671_v35, %v31_v3 }
  0x78   :  { %v78_v17 = vmul.f32 %v673_v36, %v31_v3  ;;  %v79_v18 = vmul.f32 %v675_v38, %v31_v3  ;;  %v80_v19 = vmul.f32 %v677_v39, %v31_v3  ;;  %v81_v20 = vmul.f32 %v679_v40, %v31_v3 }
  0x79   :  { %v178_v22 = vadd.f32 %v146_v5, %v74_v13  ;;  %v179_v23 = vadd.f32 %v147_v6, %v75_v14  ;;  %v180_v24 = vadd.f32 %v148_v7, %v76_v15  ;;  %v181_v25 = vadd.f32 %v149_v8, %v77_v16 }
  0x7a   :  { %v182_v26 = vadd.f32 %v150_v9, %v78_v17  ;;  %v183_v27 = vadd.f32 %v151_v10, %v79_v18  ;;  %v184_v28 = vadd.f32 %v152_v11, %v80_v19  ;;  %v185_v29 = vadd.f32 %v153_v12, %v81_v20 }
  0x7b   :  { %v731_v32 = vadd.f32 %v217_v21, %v178_v22  ;;  %v733_v33 = vadd.f32 %v217_v21, %v179_v23  ;;  %v735_v37 = vadd.f32 %v217_v21, %v180_v24  ;;  %v737_v41 = vadd.f32 %v217_v21, %v181_v25 }
  0x7c   :  { %v739_v47 = vadd.f32 %v217_v21, %v182_v26  ;;  %v741_v50 = vadd.f32 %v217_v21, %v183_v27  ;;  %v743_v2 = vadd.f32 %v217_v21, %v184_v28  ;;  %v745_v3 = vadd.f32 %v217_v21, %v185_v29  ;;  %v112_v5 = vpop.permute.xlu1 %111  ;;  %v36_v6 = vpop.permute.xlu0 %35 }
  0x7d   :  { %v747_v7 = vadd.f32 %v163_v59, %v91_v51  ;;  %v749_v8 = vadd.f32 %v164_v60, %v92_v52  ;;  %v751_v9 = vadd.f32 %v165_v61, %v93_v53  ;;  %v753_v10 = vadd.f32 %v166_v62, %v94_v55 }
  0x7e   :  { %v266_v11 = vmax.f32 %v731_v32, 0.0  ;;  %v756_v12 = vadd.f32 %v167_v63, %v95_v56  ;;  %v758_v13 = vadd.f32 %v168_v0, %v96_v57  ;;  %v760_v14 = vadd.f32 %v169_v1, %v97_v58 }
  0x7f   :  { %v267_v15 = vmax.f32 %v733_v33, 0.0  ;;  %v154_v56 = vmul.f32 %v681_v42, %v112_v5  ;;  %v155_v57 = vmul.f32 %v683_v43, %v112_v5  ;;  %v156_v58 = vmul.f32 %v685_v44, %v112_v5 }
  0x80   :  { %v157_v60 = vmul.f32 %v687_v45, %v112_v5  ;;  %v82_v61 = vmul.f32 %v665_v30, %v36_v6  ;;  %v158_v62 = vmul.f32 %v689_v46, %v112_v5  ;;  %v159_v63 = vmul.f32 %v692_v48, %v112_v5 }
  0x81   :  { %v160_v0 = vmul.f32 %v694_v49, %v112_v5  ;;  %v161_v1 = vmul.f32 %v700_v54, %v112_v5  ;;  %v83_v17 = vmul.f32 %v667_v31, %v36_v6  ;;  %v84_v18 = vmul.f32 %v669_v34, %v36_v6 }
  0x82   :  { %v85_v19 = vmul.f32 %v671_v35, %v36_v6  ;;  %v86_v20 = vmul.f32 %v673_v36, %v36_v6  ;;  %v87_v21 = vmul.f32 %v675_v38, %v36_v6  ;;  %v88_v22 = vmul.f32 %v677_v39, %v36_v6 }
  0x83   :  { %v89_v23 = vmul.f32 %v679_v40, %v36_v6  ;;  %v186_v26 = vadd.f32 %v154_v56, %v82_v61  ;;  %v187_v61 = vadd.f32 %v155_v57, %v83_v17  ;;  %v916_v32 = vmax.f32 %v745_v3, 0.0 }
  0x84   :  { %v120_v24 = vpop.permute.xlu1 %119  ;;  %v46_v25 = vpop.permute.xlu0 %45  ;;  %v189_v51 = vadd.f32 %v157_v60, %v85_v19 }
  0x85   :  { %v170_v27 = vmul.f32 %v681_v42, %v120_v24  ;;  %v171_v28 = vmul.f32 %v683_v43, %v120_v24  ;;  %v172_v29 = vmul.f32 %v685_v44, %v120_v24  ;;  %v173_v5 = vmul.f32 %v687_v45, %v120_v24 }
  0x86   :  { %v174_v59 = vmul.f32 %v689_v46, %v120_v24  ;;  %v175_v55 = vmul.f32 %v692_v48, %v120_v24  ;;  %v176_v53 = vmul.f32 %v694_v49, %v120_v24  ;;  %v177_v52 = vmul.f32 %v700_v54, %v120_v24 }
  0x87   :  { %v98_v6 = vmul.f32 %v665_v30, %v46_v25  ;;  %v99_v56 = vmul.f32 %v667_v31, %v46_v25  ;;  %v100_v42 = vmul.f32 %v669_v34, %v46_v25  ;;  %v101_v43 = vmul.f32 %v671_v35, %v46_v25 }
  0x88   :  { %v102_v44 = vmul.f32 %v673_v36, %v46_v25  ;;  %v103_v45 = vmul.f32 %v675_v38, %v46_v25  ;;  %v104_v46 = vmul.f32 %v677_v39, %v46_v25  ;;  %v105_v48 = vmul.f32 %v679_v40, %v46_v25 }
  0x89   :  { %v188_v49 = vadd.f32 %v156_v58, %v84_v18  ;;  %v190_v54 = vadd.f32 %v158_v62, %v86_v20  ;;  %v191_v24 = vadd.f32 %v159_v63, %v87_v21  ;;  %v192_v30 = vadd.f32 %v160_v0, %v88_v22 }
  0x8a   :  { %v193_v16 = vadd.f32 %v161_v1, %v89_v23  ;;  %v804_v31 = vstv %s909_s4  ;;  %v806_v34 = vadd.f32 %v170_v27, %v98_v6  ;;  %v808_v35 = vadd.f32 %v171_v28, %v99_v56 }
  0x8b   :  { %v810_v36 = vadd.f32 %v172_v29, %v100_v42  ;;  %v812_v38 = vadd.f32 %v173_v5, %v101_v43  ;;  %v814_v40 = vadd.f32 %v174_v59, %v102_v44  ;;  %v816_v57 = vadd.f32 %v175_v55, %v103_v45  ;;  %v232_v5 = vpop.permute.xlu2 %231 }
  0x8c   :  { %v222_v39 = vpop.permute.xlu0 %221  ;;  %v818_v58 = vadd.f32 %v176_v53, %v104_v46  ;;  %v820_v60 = vadd.f32 %v177_v52, %v105_v48  ;;  %v259_v3 = vadd.f32 %v232_v5, %v808_v35 }
  0x8d   :  { %v227_v62 = vpop.permute.xlu1 %226  ;;  %v242_v63 = vadd.f32 %v222_v39, %v186_v26  ;;  %v243_v0 = vadd.f32 %v222_v39, %v187_v61  ;;  %v244_v1 = vadd.f32 %v222_v39, %v188_v49  ;;  %v245_v17 = vadd.f32 %v222_v39, %v189_v51 }
  0x8e   :  { %v823_v18 = vadd.f32 %v227_v62, %v713_v4  ;;  %v826_v19 = vadd.f32 %v227_v62, %v747_v7  ;;  %v829_v59 = vadd.f32 %v227_v62, %v749_v8  ;;  %v832_v55 = vadd.f32 %v227_v62, %v751_v9 }
  0x8f   :  { %v835_v52 = vadd.f32 %v227_v62, %v753_v10  ;;  %v838_v53 = vadd.f32 %v227_v62, %v756_v12  ;;  %v841_v51 = vadd.f32 %v227_v62, %v758_v13  ;;  %v844_v4 = vadd.f32 %v227_v62, %v760_v14 }
  0x90   :  { %v282_v7 = vmax.f32 %v823_v18, 0.0  ;;  %v283_v8 = vmax.f32 %v826_v19, 0.0  ;;  %v284_v20 = vmax.f32 %v829_v59, 0.0  ;;  %v285_v9 = vmax.f32 %v832_v55, 0.0 }
  0x91   :  { %v286_v10 = vmax.f32 %v835_v52, 0.0  ;;  %v287_v21 = vmax.f32 %v838_v53, 0.0  ;;  %v288_v12 = vmax.f32 %v841_v51, 0.0  ;;  %v289_v13 = vmax.f32 %v844_v4, 0.0 }
  0x92   :  { %v246_v22 = vadd.f32 %v222_v39, %v190_v54  ;;  %v247_v23 = vadd.f32 %v222_v39, %v191_v24  ;;  %v248_v14 = vadd.f32 %v222_v39, %v192_v30  ;;  %v249_v25 = vadd.f32 %v222_v39, %v193_v16 }
  0x93   :  { %v274_v26 = vmax.f32 %v242_v63, 0.0  ;;  %v275_v27 = vmax.f32 %v243_v0, 0.0  ;;  %v276_v28 = vmax.f32 %v244_v1, 0.0  ;;  %v277_v29 = vmax.f32 %v245_v17, 0.0 }
  0x94   :  { %v305_v6 = vpop.permute.xlu0 %304  ;;  %v278_v56 = vmax.f32 %v246_v22, 0.0  ;;  %v279_v42 = vmax.f32 %v247_v23, 0.0  ;;  %v280_v43 = vmax.f32 %v248_v14, 0.0  ;;  %v281_v44 = vmax.f32 %v249_v25, 0.0 }
  0x95   :  { %v310_v45 = vpop.permute.xlu1 %309  ;;  %v322_v46 = vmul.f32 %v305_v6, %v266_v11  ;;  %v323_v48 = vmul.f32 %v305_v6, %v267_v15  ;;  %v911_v61 = vmax.f32 %v735_v37, 0.0  ;;  %v912_v49 = vmax.f32 %v737_v41, 0.0 }
  0x96   :  { %v913_v24 = vmax.f32 %v739_v47, 0.0  ;;  %v914_v39 = vmax.f32 %v741_v50, 0.0  ;;  %v915_v63 = vmax.f32 %v743_v2, 0.0  ;;  %v329_v11 = vmul.f32 %v305_v6, %v916_v32 }
  0x97   :  { %v324_v16 = vmul.f32 %v305_v6, %v911_v61  ;;  %v325_v54 = vmul.f32 %v305_v6, %v912_v49  ;;  %v330_v33 = vmul.f32 %v310_v45, %v274_v26  ;;  %v331_v15 = vmul.f32 %v310_v45, %v275_v27 }
  0x98   :  { %v326_v30 = vmul.f32 %v305_v6, %v913_v24  ;;  %v327_v62 = vmul.f32 %v305_v6, %v914_v39  ;;  %v328_v0 = vmul.f32 %v305_v6, %v915_v63  ;;  %v332_v1 = vmul.f32 %v310_v45, %v276_v28 }
  0x99   :  { %v333_v37 = vmul.f32 %v310_v45, %v277_v29  ;;  %v334_v17 = vmul.f32 %v310_v45, %v278_v56  ;;  %v335_v22 = vmul.f32 %v310_v45, %v279_v42  ;;  %v336_v41 = vmul.f32 %v310_v45, %v280_v43 }
  0x9a   :  { %v337_v23 = vmul.f32 %v310_v45, %v281_v44  ;;  %v354_v14 = vadd.f32 %v330_v33, %v322_v46  ;;  %v363_v47 = vadd.f32 %v331_v15, %v323_v48  ;;  %v372_v25 = vadd.f32 %v332_v1, %v324_v16  ;;  %v315_v46 = vpop.permute.xlu2 %314 }
  0x9b   :  { %v381_v61 = vadd.f32 %v333_v37, %v325_v54  ;;  %v390_v50 = vadd.f32 %v334_v17, %v326_v30  ;;  %v399_v49 = vadd.f32 %v335_v22, %v327_v62  ;;  %v408_v24 = vadd.f32 %v336_v41, %v328_v0 }
  0x9c   :  { %v417_v2 = vadd.f32 %v337_v23, %v329_v11  ;;  %v258_v39 = vadd.f32 %v232_v5, %v806_v34  ;;  %v260_v26 = vadd.f32 %v232_v5, %v810_v36  ;;  %v261_v27 = vadd.f32 %v232_v5, %v812_v38  ;;  %v320_v34 = vpop.permute.xlu0 %319 }
  0x9d   :  { %v262_v28 = vadd.f32 %v232_v5, %v814_v40  ;;  %v263_v29 = vadd.f32 %v232_v5, %v816_v57  ;;  %v264_v6 = vadd.f32 %v232_v5, %v818_v58  ;;  %v265_v56 = vadd.f32 %v232_v5, %v820_v60 }
  0x9e   :  { %v290_v42 = vmax.f32 %v258_v39, 0.0  ;;  %v291_v43 = vmax.f32 %v259_v3, 0.0  ;;  %v292_v44 = vmax.f32 %v260_v26, 0.0  ;;  %v293_v45 = vmax.f32 %v261_v27, 0.0 }
  0x9f   :  { %v294_v48 = vmax.f32 %v262_v28, 0.0  ;;  %v295_v35 = vmax.f32 %v263_v29, 0.0  ;;  %v296_v16 = vmax.f32 %v264_v6, 0.0  ;;  %v297_v36 = vmax.f32 %v265_v56, 0.0 }
  0xa0   :  { %v338_v38 = vmul.f32 %v315_v46, %v282_v7  ;;  %v339_v40 = vmul.f32 %v315_v46, %v283_v8  ;;  %v340_v57 = vmul.f32 %v315_v46, %v284_v20  ;;  %v341_v58 = vmul.f32 %v315_v46, %v285_v9 }
  0xa1   :  { %v342_v60 = vmul.f32 %v315_v46, %v286_v10  ;;  %v343_v5 = vmul.f32 %v315_v46, %v287_v21  ;;  %v344_v54 = vmul.f32 %v315_v46, %v288_v12  ;;  %v345_v18 = vmul.f32 %v315_v46, %v289_v13 }
  0xa2   :  { %v346_v19 = vmul.f32 %v320_v34, %v290_v42  ;;  %v347_v7 = vmul.f32 %v320_v34, %v291_v43  ;;  %v348_v8 = vmul.f32 %v320_v34, %v292_v44  ;;  %v349_v59 = vmul.f32 %v320_v34, %v293_v45 }
  0xa3   :  { %v350_v20 = vmul.f32 %v320_v34, %v294_v48  ;;  %v351_v30 = vmul.f32 %v320_v34, %v295_v35  ;;  %v352_v55 = vmul.f32 %v320_v34, %v296_v16  ;;  %v353_v9 = vmul.f32 %v320_v34, %v297_v36 }
  0xa4   :  { %v355_v62 = vadd.f32 %v354_v14, %v338_v38  ;;  %v364_v52 = vadd.f32 %v363_v47, %v339_v40  ;;  %v373_v10 = vadd.f32 %v372_v25, %v340_v57  ;;  %v382_v63 = vadd.f32 %v381_v61, %v341_v58 }
  0xa5   :  { %v391_v53 = vadd.f32 %v390_v50, %v342_v60  ;;  %v400_v21 = vadd.f32 %v399_v49, %v343_v5  ;;  %v409_v0 = vadd.f32 %v408_v24, %v344_v54  ;;  %v418_v51 = vadd.f32 %v417_v2, %v345_v18 }
  0xa6   :  { %v356_v12 = vadd.f32 %v355_v62, %v346_v19  ;;  %v365_v32 = vadd.f32 %v364_v52, %v347_v7  ;;  %v374_v4 = vadd.f32 %v373_v10, %v348_v8  ;;  %v383_v13 = vadd.f32 %v382_v63, %v349_v59 }
  0xa7   :  { %v392_v11 = vadd.f32 %v391_v53, %v350_v20  ;;  %v401_v33 = vadd.f32 %v400_v21, %v351_v30  ;;  %v410_v15 = vadd.f32 %v409_v0, %v352_v55  ;;  %v419_v1 = vadd.f32 %v418_v51, %v353_v9 }
  0xa8   :  { %v357_v37 = vrot.slane %v356_v12, 4  ;;  %v366_v17 = vrot.slane %v365_v32, 4  ;;  %v375_v22 = vrot.slane %v374_v4, 4  ;;  %v384_v41 = vrot.slane %v383_v13, 4 }
  0xa9   :  { %v393_v23 = vrot.slane %v392_v11, 4  ;;  %v402_v14 = vrot.slane %v401_v33, 4  ;;  %v411_v47 = vrot.slane %v410_v15, 4  ;;  %v420_v25 = vrot.slane %v419_v1, 4 }
  0xaa   :  { %v358_v61 = vadd.f32 %v357_v37, %v356_v12  ;;  %v367_v50 = vadd.f32 %v366_v17, %v365_v32  ;;  %v376_v49 = vadd.f32 %v375_v22, %v374_v4  ;;  %v385_v24 = vadd.f32 %v384_v41, %v383_v13 }
  0xab   :  { %v394_v2 = vadd.f32 %v393_v23, %v392_v11  ;;  %v403_v39 = vadd.f32 %v402_v14, %v401_v33  ;;  %v412_v3 = vadd.f32 %v411_v47, %v410_v15  ;;  %v421_v26 = vadd.f32 %v420_v25, %v419_v1 }
  0xac   :  { %v359_v27 = vrot.slane %v358_v61, 2  ;;  %v368_v28 = vrot.slane %v367_v50, 2  ;;  %v377_v29 = vrot.slane %v376_v49, 2  ;;  %v386_v6 = vrot.slane %v385_v24, 2 }
  0xad   :  { %v395_v56 = vrot.slane %v394_v2, 2  ;;  %v404_v42 = vrot.slane %v403_v39, 2  ;;  %v413_v43 = vrot.slane %v412_v3, 2  ;;  %v422_v44 = vrot.slane %v421_v26, 2 }
  0xae   :  { %v360_v45 = vadd.f32 %v359_v27, %v358_v61  ;;  %v369_v46 = vadd.f32 %v368_v28, %v367_v50  ;;  %v378_v34 = vadd.f32 %v377_v29, %v376_v49  ;;  %v387_v48 = vadd.f32 %v386_v6, %v385_v24 }
  0xaf   :  { %v396_v35 = vadd.f32 %v395_v56, %v394_v2  ;;  %v405_v16 = vadd.f32 %v404_v42, %v403_v39  ;;  %v414_v36 = vadd.f32 %v413_v43, %v412_v3  ;;  %v423_v38 = vadd.f32 %v422_v44, %v421_v26 }
  0xb0   :  { %v361_v40 = vrot.slane %v360_v45, 1  ;;  %v370_v57 = vrot.slane %v369_v46, 1  ;;  %v379_v58 = vrot.slane %v378_v34, 1  ;;  %v388_v60 = vrot.slane %v387_v48, 1 }
  0xb1   :  { %v397_v5 = vrot.slane %v396_v35, 1  ;;  %v406_v54 = vrot.slane %v405_v16, 1  ;;  %v415_v18 = vrot.slane %v414_v36, 1  ;;  %v424_v19 = vrot.slane %v423_v38, 1 }
  0xb2   :  { %v362_v7 = vadd.f32 %v361_v40, %v360_v45  ;;  %v371_v8 = vadd.f32 %v370_v57, %v369_v46  ;;  %v380_v59 = vadd.f32 %v379_v58, %v378_v34  ;;  %v389_v20 = vadd.f32 %v388_v60, %v387_v48 }
  0xb3   :  { %v398_v30 = vadd.f32 %v397_v5, %v396_v35  ;;  %v407_v55 = vadd.f32 %v406_v54, %v405_v16  ;;  %v416_v9 = vadd.f32 %v415_v18, %v414_v36  ;;  %v425_v62 = vadd.f32 %v424_v19, %v423_v38 }
  0xb4   :  { %v428_v52 = vadd.f32 %v804_v31, %v362_v7  ;;  %v429_v10 = vadd.f32 %v804_v31, %v371_v8  ;;  %v430_v63 = vadd.f32 %v804_v31, %v380_v59  ;;  %v431_v53 = vadd.f32 %v804_v31, %v389_v20 }
  0xb5   :  { %v432_v21 = vadd.f32 %v804_v31, %v398_v30  ;;  %v433_v0 = vadd.f32 %v804_v31, %v407_v55  ;;  %v434_v51 = vadd.f32 %v804_v31, %v416_v9  ;;  %v435_v12 = vadd.f32 %v804_v31, %v425_v62 }
  0xb6   :  { %v436_v32 = vsub.f32 0.0, %v428_v52  ;;  %v437_v4 = vsub.f32 0.0, %v429_v10  ;;  %v438_v13 = vsub.f32 0.0, %v430_v63  ;;  %v439_v11 = vsub.f32 0.0, %v431_v53 }
  0xb7   :  { %v440_v33 = vsub.f32 0.0, %v432_v21  ;;  %v441_v15 = vsub.f32 0.0, %v433_v0  ;;  %v442_v1 = vsub.f32 0.0, %v434_v51  ;;  %v443_v41 = vsub.f32 0.0, %v435_v12 }
  0xb8   :  { %v444_v37 = vmul.f32 1.442695, %v436_v32  ;;  %v446_v17 = vmul.f32 1.442695, %v437_v4  ;;  %v448_v22 = vmul.f32 1.442695, %v438_v13 }
  0xb9   :  { %v450_v23 = vmul.f32 1.442695, %v439_v11  ;;  %v452_v14 = vmul.f32 1.442695, %v440_v33  ;;  %v454_v47 = vmul.f32 1.442695, %v441_v15 }
  0xba   :  { %532 = vpow2.f32 %v444_v37  ;;  %v456_v25 = vmul.f32 1.442695, %v442_v1  ;;  %v458_v31 = vmul.f32 1.442695, %v443_v41 }
  0xbb   :  { %534 = vpow2.f32 %v446_v17 }
  0xbc   :  { %536 = vpow2.f32 %v448_v22 }
  0xbd   :  { %538 = vpow2.f32 %v450_v23 }
  0xbe   :  { %540 = vpow2.f32 %v452_v14 }
  0xbf   :  { %542 = vpow2.f32 %v454_v47 }
  0xc0   :  { %v533_v61 = vpop.eup %532  ;;  %544 = vpow2.f32 %v456_v25 }
  0xc1   :  { %v535_v50 = vpop.eup %534  ;;  %546 = vpow2.f32 %v458_v31  ;;  %v460_v49 = vadd.f32 1.0, %v533_v61 }
  0xc2   :  { %v537_v24 = vpop.eup %536  ;;  %v461_v2 = vadd.f32 1.0, %v535_v50 }
  0xc3   :  { %v539_v39 = vpop.eup %538  ;;  %v462_v3 = vadd.f32 1.0, %v537_v24  ;;  %548 = vrcp.f32 %v460_v49 }
  0xc4   :  { %v541_v26 = vpop.eup %540  ;;  %v463_v27 = vadd.f32 1.0, %v539_v39  ;;  %550 = vrcp.f32 %v461_v2 }
  0xc5   :  { %v543_v28 = vpop.eup %542  ;;  %v464_v29 = vadd.f32 1.0, %v541_v26  ;;  %552 = vrcp.f32 %v462_v3 }
  0xc6   :  { %v545_v6 = vpop.eup %544  ;;  %v465_v56 = vadd.f32 1.0, %v543_v28  ;;  %554 = vrcp.f32 %v463_v27 }
  0xc7   :  { %v547_v42 = vpop.eup %546  ;;  %v466_v43 = vadd.f32 1.0, %v545_v6  ;;  %556 = vrcp.f32 %v464_v29 }
  0xc8   :  { %v467_v44 = vadd.f32 1.0, %v547_v42  ;;  %558 = vrcp.f32 %v465_v56 }
  0xc9   :  { %v549_v45 = vpop.eup %548  ;;  %560 = vrcp.f32 %v466_v43 }
  0xca   :  { %v551_v46 = vpop.eup %550  ;;  %562 = vrcp.f32 %v467_v44 }
  0xcb   :  { %v553_v34 = vpop.eup %552  ;;  %v484_v48 = vrot.slane %v551_v46, 7 }
  0xcc   :  { %v555_v35 = vpop.eup %554  ;;  %v485_v16 = vrot.slane %v553_v34, 6 }
  0xcd   :  { %v557_v36 = vpop.eup %556  ;;  %v486_v38 = vrot.slane %v555_v35, 5  ;;  %v492_v5 = vsel %vm491_vm0, %v549_v45, %v484_v48 }
  0xce   :  { %v559_v40 = vpop.eup %558  ;;  %v487_v57 = vrot.slane %v557_v36, 4 }
  0xcf   :  { %v561_v58 = vpop.eup %560  ;;  %v488_v60 = vrot.slane %v559_v40, 3  ;;  %v494_v54 = vsel %vm493_vm1, %v485_v16, %v486_v38 }
  0xd0   :  { %v563_v18 = vpop.eup %562  ;;  %v489_v19 = vrot.slane %v561_v58, 2  ;;  %v496_v59 = vsel %vm495_vm3, %v492_v5, %v494_v54 }
  0xd1   :  { %v490_v7 = vrot.slane %v563_v18, 1  ;;  %v498_v8 = vsel %vm497_vm2, %v487_v57, %v488_v60 }
  0xd3   :  { %v500_v20 = vsel %vm499_vm4, %v489_v19, %v490_v7 }
  0xd4   :  { %v502_v30 = vsel %vm501_vm5, %v498_v8, %v500_v20 }
  0xd5   :  { %v504_v55 = vsel %vm503_vm6, %v496_v59, %v502_v30 }
  0xd6   :  { %506 = vst [vmem:[#allocation3] sm:$0xff] %v504_v55 }
  0xd7   :  { %510 = vsyncadd [#allocation4], 112  ;;  %s514_s20 = sshll.u32 %s910_s5, 4  ;;  %s592_s21 = smov [#allocation3]   ;;  %s515_s20 = int_to_ptr.hbm [resolvable:$true] %s514_s20 }
  0xd8   :  { %s512_s22 = sshll.u32 %s592_s21, 4  ;;  %s513_s22 = int_to_ptr.vmem [resolvable:$true] %s512_s22 }
  0xd9   :  { %517 = dma.vmem_to_hbm [thread:$0]  %s513_s22, 16, %s515_s20, [#allocation4]  }
  0xda   :  { %588 = dma.done.wait [#allocation4], 128  }
  0xdb   :  { %589 = vsyncadd [#allocation4], 4294967168 }
  0xdc   :  { %522 = vsyncpa [#allocation4], 1 }

</bundles_post_ra>
